<compile_context>
chip_gen: v7x
topology: tpu7x:2x2x1
jax: 0.10.0
libtpu: 0.0.40
codegen_flags: <defaults>
</compile_context>

<pallas_src>
import functools

import jax
import jax.numpy as jnp
from jax import lax
from jax.experimental import pallas as pl
from jax.experimental.pallas import tpu as pltpu


def _kernel_fine(rgb_c_ref, rgb_f_ref, tgt_ref, mask_ref, out_ref,
                 acc_c, acc_f, acc_n, *, rows, block_rows, lanes):
    i = pl.program_id(0)

    @pl.when(i == 0)
    def _init():
        acc_c[...] = jnp.zeros_like(acc_c)
        acc_f[...] = jnp.zeros_like(acc_f)
        acc_n[...] = jnp.zeros_like(acc_n)

    # Rows past the end of the (possibly non-divisible) array come from a
    # bounds-limited DMA and hold unspecified data -> select them to zero.
    row_ids = lax.broadcasted_iota(jnp.int32, (block_rows, lanes), 0)
    in_range = row_ids < (rows - i * block_rows)

    m = jnp.where(in_range, mask_ref[...].astype(jnp.float32), 0.0)
    t = tgt_ref[...].astype(jnp.float32)
    dc = rgb_c_ref[...].astype(jnp.float32) - t
    df = rgb_f_ref[...].astype(jnp.float32) - t

    # Steady state: pure VPU elementwise multiply-add (no per-step reduction).
    acc_c[...] += jnp.where(in_range, dc * dc, 0.0) * m
    acc_f[...] += jnp.where(in_range, df * df, 0.0) * m
    acc_n[...] += m

    @pl.when(i == pl.num_programs(0) - 1)
    def _epilogue():
        # One lane-dense store: lane 0 = sum_c, lane 1 = sum_f, lane 2 = count.
        lane = lax.broadcasted_iota(jnp.int32, (1, 128), 1)
        out_ref[...] = (jnp.where(lane == 0, jnp.sum(acc_c[...]), 0.0)
                        + jnp.where(lane == 1, jnp.sum(acc_f[...]), 0.0)
                        + jnp.where(lane == 2, jnp.sum(acc_n[...]), 0.0))


def _kernel_coarse(rgb_c_ref, tgt_ref, mask_ref, out_ref,
                   acc_c, acc_n, *, rows, block_rows, lanes):
    i = pl.program_id(0)

    @pl.when(i == 0)
    def _init():
        acc_c[...] = jnp.zeros_like(acc_c)
        acc_n[...] = jnp.zeros_like(acc_n)

    row_ids = lax.broadcasted_iota(jnp.int32, (block_rows, lanes), 0)
    in_range = row_ids < (rows - i * block_rows)

    m = jnp.where(in_range, mask_ref[...].astype(jnp.float32), 0.0)
    t = tgt_ref[...].astype(jnp.float32)
    dc = rgb_c_ref[...].astype(jnp.float32) - t

    acc_c[...] += jnp.where(in_range, dc * dc, 0.0) * m
    acc_n[...] += m

    @pl.when(i == pl.num_programs(0) - 1)
    def _epilogue():
        lane = lax.broadcasted_iota(jnp.int32, (1, 128), 1)
        out_ref[...] = (jnp.where(lane == 0, jnp.sum(acc_c[...]), 0.0)
                        + jnp.where(lane == 2, jnp.sum(acc_n[...]), 0.0))


def color_loss(inputs, batch, coef=1.0, *, lanes=512, tile_rows=512,
               vmem_limit_bytes=None):
    """JAX/Pallas equivalent of ColorLoss(coef, instance_only=False).forward.

    Default (tile_rows, lanes) = (512, 512) gives 1 MiB f32 blocks per input
    (4 inputs x 2 buffers + 3 accumulators ~= 11 MiB), which fits the default
    scoped VMEM on v5e/v6e/v7x; raise tile_rows (and vmem_limit_bytes) on v6e
    for larger blocks.
    """
    targets = batch['rgbs'].reshape(-1)            # (3N,) channel-contiguous
    valid = batch['valid_mask'].reshape(-1)
    rgb_c = inputs['rgb_coarse'].reshape(-1)
    has_fine = 'rgb_fine' in inputs

    stream_dtype = inputs['rgb_coarse'].dtype      # stream native dtype, upcast in-kernel
    # Per-element mask (valid ray -> all 3 channels), flattened lane-dense.
    # TODO(synk): this materializes an extra equal-size stream (~25% of input
    # traffic); avoiding it needs an in-kernel 3x lane expansion of a per-ray
    # mask, which has no cheap Mosaic lowering.
    mask = jnp.repeat(valid.astype(stream_dtype), 3)

    f_len = int(targets.shape[0])
    rows = -(-f_len // lanes)
    block_rows = min(tile_rows, rows)
    num_blocks = -(-rows // block_rows)
    padded_len = rows * lanes

    ops = [rgb_c]
    if has_fine:
        ops.append(inputs['rgb_fine'].reshape(-1))
    ops += [targets, mask]

    if padded_len != f_len:
        # Small zero-pad (< lanes elements) so the flat stream reshapes 2D.
        ops = [jnp.pad(a, (0, padded_len - f_len)) for a in ops]
    ops = [a.reshape(rows, lanes) for a in ops]

    n_acc = 3 if has_fine else 2
    kernel = functools.partial(
        _kernel_fine if has_fine else _kernel_coarse,
        rows=rows, block_rows=block_rows, lanes=lanes)

    in_spec = pl.BlockSpec((block_rows, lanes), lambda i: (i, 0))
    out_spec = pl.BlockSpec((1, 128), lambda i: (0, 0))

    bytes_accessed = sum(int(a.size) * a.dtype.itemsize for a in ops) + 128 * 4
    cost = pl.CostEstimate(flops=(10 if has_fine else 6) * padded_len,
                           transcendentals=0,
                           bytes_accessed=bytes_accessed)

    cp_kwargs = dict(dimension_semantics=("arbitrary",))
    if vmem_limit_bytes is not None:
        cp_kwargs["vmem_limit_bytes"] = vmem_limit_bytes

    out = pl.pallas_call(
        kernel,
        out_shape=jax.ShapeDtypeStruct((1, 128), jnp.float32),
        grid_spec=pltpu.PrefetchScalarGridSpec(
            num_scalar_prefetch=0,
            grid=(num_blocks,),
            in_specs=[in_spec] * len(ops),
            out_specs=out_spec,
            scratch_shapes=[pltpu.VMEM((block_rows, lanes), jnp.float32)
                            for _ in range(n_acc)]),
        compiler_params=pltpu.CompilerParams(**cp_kwargs),
        cost_estimate=cost,
    )(*ops)

    cnt = out[0, 2]
    loss = out[0, 0] / cnt          # NaN if no valid rays == torch .mean() of empty
    if has_fine:
        loss = loss + out[0, 1] / cnt
    # TODO(synk): instance_only branch (boolean gather of masked elements +
    # early-return-None) has no static-shape Pallas equivalent; only the
    # default path is implemented.
    return coef * loss


if __name__ == "__main__":
    key = jax.random.PRNGKey(0)
    k1, k2, k3, k4 = jax.random.split(key, 4)

    # Small shapes; N chosen so the flat length is NOT a multiple of the lane
    # width, exercising the pad + partial-block + multi-step accumulation path.
    B, nrays = 2, 171                       # N = 342 rays -> 1026 flat elems
    rgbs = jax.random.uniform(k1, (B, nrays, 3), jnp.float32)
    valid_mask = jax.random.uniform(k2, (B, nrays)) > 0.3
    rgb_coarse = jax.random.uniform(k3, (B * nrays, 3), jnp.float32)
    rgb_fine = jax.random.uniform(k4, (B * nrays, 3), jnp.float32)

    tgt = rgbs.reshape(-1, 3)
    m = valid_mask.reshape(-1)

    # Case 1: coarse + fine, small tiles -> multi-block grid + partial tail.
    inputs = {'rgb_coarse': rgb_coarse, 'rgb_fine': rgb_fine}
    batch = {'rgbs': rgbs, 'valid_mask': valid_mask}
    loss = color_loss(inputs, batch, coef=1.0, lanes=128, tile_rows=8)
    loss = jax.block_until_ready(loss)
    ref = (((rgb_coarse - tgt) ** 2)[m].mean()
           + ((rgb_fine - tgt) ** 2)[m].mean())
    assert jnp.allclose(loss, ref, rtol=1e-4, atol=1e-6), (loss, ref)

    # Case 2: coarse-only variant with the default lane-dense tiling.
    inputs_c = {'rgb_coarse': rgb_coarse}
    loss_c = color_loss(inputs_c, batch, coef=0.5)
    loss_c = jax.block_until_ready(loss_c)
    ref_c = 0.5 * ((rgb_coarse - tgt) ** 2)[m].mean()
    assert jnp.allclose(loss_c, ref_c, rtol=1e-4, atol=1e-6), (loss_c, ref_c)

    print("KERNEL_OK")
</pallas_src>

<mosaic_0001>
module attributes {stable_mosaic.version = 11 : i64} {
  func.func @_kernel_fine(%arg0: i32, %arg1: memref<8x128xf32, #tpu.memory_space<vmem>>, %arg2: memref<8x128xf32, #tpu.memory_space<vmem>>, %arg3: memref<8x128xf32, #tpu.memory_space<vmem>>, %arg4: memref<8x128xf32, #tpu.memory_space<vmem>>, %arg5: memref<1x128xf32, #tpu.memory_space<vmem>>, %arg6: memref<8x128xf32, #tpu.memory_space<vmem>>, %arg7: memref<8x128xf32, #tpu.memory_space<vmem>>, %arg8: memref<8x128xf32, #tpu.memory_space<vmem>>) attributes {dimension_semantics = [#tpu.dimension_semantics<arbitrary>], iteration_bounds = array<i64: 2>, scalar_prefetch = 0 : i64, scratch_operands = 3 : i64, tpu.core_type = #tpu.core_type<tc>, window_params = [{transform_indices = @transform_0, window_bounds = array<i64: 8, 128>}, {transform_indices = @transform_1, window_bounds = array<i64: 8, 128>}, {transform_indices = @transform_2, window_bounds = array<i64: 8, 128>}, {transform_indices = @transform_3, window_bounds = array<i64: 8, 128>}, {pipeline_mode = #tpu.pipeline_mode<synchronous>, transform_indices = @transform_4, window_bounds = array<i64: 1, 128>}]} {
    %c0_i32 = arith.constant 0 : i32
    %0 = arith.cmpi eq, %arg0, %c0_i32 : i32
    %1 = arith.extui %0 : i1 to i32
    %c0_i32_0 = arith.constant 0 : i32
    %2 = arith.cmpi ne, %1, %c0_i32_0 : i32
    scf.if %2 {
      %cst_23 = arith.constant 0.000000e+00 : f32
      %36 = vector.broadcast %cst_23 : f32 to vector<8x128xf32>
      %c0_24 = arith.constant 0 : index
      %c0_25 = arith.constant 0 : index
      %37 = vector.load %arg6[%c0_24, %c0_25] : memref<8x128xf32, #tpu.memory_space<vmem>>, vector<8x128xf32>
      tpu.vector_store %arg6[%c0_24, %c0_25], %36 {strides = array<i32>} : memref<8x128xf32, #tpu.memory_space<vmem>>, vector<8x128xf32>,
      %cst_26 = arith.constant 0.000000e+00 : f32
      %38 = vector.broadcast %cst_26 : f32 to vector<8x128xf32>
      %c0_27 = arith.constant 0 : index
      %c0_28 = arith.constant 0 : index
      %39 = vector.load %arg7[%c0_27, %c0_28] : memref<8x128xf32, #tpu.memory_space<vmem>>, vector<8x128xf32>
      tpu.vector_store %arg7[%c0_27, %c0_28], %38 {strides = array<i32>} : memref<8x128xf32, #tpu.memory_space<vmem>>, vector<8x128xf32>,
      %cst_29 = arith.constant 0.000000e+00 : f32
      %40 = vector.broadcast %cst_29 : f32 to vector<8x128xf32>
      %c0_30 = arith.constant 0 : index
      %c0_31 = arith.constant 0 : index
      %41 = vector.load %arg8[%c0_30, %c0_31] : memref<8x128xf32, #tpu.memory_space<vmem>>, vector<8x128xf32>
      tpu.vector_store %arg8[%c0_30, %c0_31], %40 {strides = array<i32>} : memref<8x128xf32, #tpu.memory_space<vmem>>, vector<8x128xf32>,
    } else {
    }
    %3 = tpu.iota {dimensions = array<i32: 0>} : vector<8x128xi32>
    %c8_i32 = arith.constant 8 : i32
    %4 = arith.muli %arg0, %c8_i32 : i32
    %c9_i32 = arith.constant 9 : i32
    %5 = arith.subi %c9_i32, %4 : i32
    %6 = vector.broadcast %5 : i32 to vector<8x128xi32>
    %7 = arith.cmpi slt, %3, %6 : vector<8x128xi32>
    %c0 = arith.constant 0 : index
    %c0_1 = arith.constant 0 : index
    %8 = vector.load %arg4[%c0, %c0_1] : memref<8x128xf32, #tpu.memory_space<vmem>>, vector<8x128xf32>
    %cst = arith.constant 0.000000e+00 : f32
    %9 = vector.broadcast %cst : f32 to vector<8x128xf32>
    %10 = arith.select %7, %8, %9 : vector<8x128xi1>, vector<8x128xf32>
    %c0_2 = arith.constant 0 : index
    %c0_3 = arith.constant 0 : index
    %11 = vector.load %arg3[%c0_2, %c0_3] : memref<8x128xf32, #tpu.memory_space<vmem>>, vector<8x128xf32>
    %c0_4 = arith.constant 0 : index
    %c0_5 = arith.constant 0 : index
    %12 = vector.load %arg1[%c0_4, %c0_5] : memref<8x128xf32, #tpu.memory_space<vmem>>, vector<8x128xf32>
    %13 = arith.subf %12, %11 : vector<8x128xf32>
    %c0_6 = arith.constant 0 : index
    %c0_7 = arith.constant 0 : index
    %14 = vector.load %arg2[%c0_6, %c0_7] : memref<8x128xf32, #tpu.memory_space<vmem>>, vector<8x128xf32>
    %15 = arith.subf %14, %11 : vector<8x128xf32>
    %c0_8 = arith.constant 0 : index
    %c0_9 = arith.constant 0 : index
    %16 = vector.load %arg6[%c0_8, %c0_9] : memref<8x128xf32, #tpu.memory_space<vmem>>, vector<8x128xf32>
    %17 = arith.mulf %13, %13 : vector<8x128xf32>
    %cst_10 = arith.constant 0.000000e+00 : f32
    %18 = vector.broadcast %cst_10 : f32 to vector<8x128xf32>
    %19 = arith.select %7, %17, %18 : vector<8x128xi1>, vector<8x128xf32>
    %20 = arith.mulf %19, %10 : vector<8x128xf32>
    %21 = arith.addf %16, %20 : vector<8x128xf32>
    %c0_11 = arith.constant 0 : index
    %c0_12 = arith.constant 0 : index
    %22 = vector.load %arg6[%c0_11, %c0_12] : memref<8x128xf32, #tpu.memory_space<vmem>>, vector<8x128xf32>
    tpu.vector_store %arg6[%c0_11, %c0_12], %21 {strides = array<i32>} : memref<8x128xf32, #tpu.memory_space<vmem>>, vector<8x128xf32>,
    %c0_13 = arith.constant 0 : index
    %c0_14 = arith.constant 0 : index
    %23 = vector.load %arg7[%c0_13, %c0_14] : memref<8x128xf32, #tpu.memory_space<vmem>>, vector<8x128xf32>
    %24 = arith.mulf %15, %15 : vector<8x128xf32>
    %cst_15 = arith.constant 0.000000e+00 : f32
    %25 = vector.broadcast %cst_15 : f32 to vector<8x128xf32>
    %26 = arith.select %7, %24, %25 : vector<8x128xi1>, vector<8x128xf32>
    %27 = arith.mulf %26, %10 : vector<8x128xf32>
    %28 = arith.addf %23, %27 : vector<8x128xf32>
    %c0_16 = arith.constant 0 : index
    %c0_17 = arith.constant 0 : index
    %29 = vector.load %arg7[%c0_16, %c0_17] : memref<8x128xf32, #tpu.memory_space<vmem>>, vector<8x128xf32>
    tpu.vector_store %arg7[%c0_16, %c0_17], %28 {strides = array<i32>} : memref<8x128xf32, #tpu.memory_space<vmem>>, vector<8x128xf32>,
    %c0_18 = arith.constant 0 : index
    %c0_19 = arith.constant 0 : index
    %30 = vector.load %arg8[%c0_18, %c0_19] : memref<8x128xf32, #tpu.memory_space<vmem>>, vector<8x128xf32>
    %31 = arith.addf %30, %10 : vector<8x128xf32>
    %c0_20 = arith.constant 0 : index
    %c0_21 = arith.constant 0 : index
    %32 = vector.load %arg8[%c0_20, %c0_21] : memref<8x128xf32, #tpu.memory_space<vmem>>, vector<8x128xf32>
    tpu.vector_store %arg8[%c0_20, %c0_21], %31 {strides = array<i32>} : memref<8x128xf32, #tpu.memory_space<vmem>>, vector<8x128xf32>,
    %c1_i32 = arith.constant 1 : i32
    %33 = arith.cmpi eq, %arg0, %c1_i32 : i32
    %34 = arith.extui %33 : i1 to i32
    %c0_i32_22 = arith.constant 0 : i32
    %35 = arith.cmpi ne, %34, %c0_i32_22 : i32
    scf.if %35 {
      %36 = tpu.iota {dimensions = array<i32: 1>} : vector<1x128xi32>
      %c0_i32_23 = arith.constant 0 : i32
      %37 = vector.broadcast %c0_i32_23 : i32 to vector<1x128xi32>
      %38 = arith.cmpi eq, %36, %37 : vector<1x128xi32>
      %c0_24 = arith.constant 0 : index
      %c0_25 = arith.constant 0 : index
      %39 = vector.load %arg6[%c0_24, %c0_25] : memref<8x128xf32, #tpu.memory_space<vmem>>, vector<8x128xf32>
      %40 = vector.shape_cast %39 : vector<8x128xf32> to vector<1x8x128xf32>
      %cst_26 = arith.constant dense<0.000000e+00> : vector<1xf32>
      %41 = vector.multi_reduction <add>, %40, %cst_26 [1, 2] : vector<1x8x128xf32> to vector<1xf32>
      %42 = vector.shape_cast %41 : vector<1xf32> to vector<1x1x1xf32>
      %43 = vector.extract %42[0, 0, 0] : f32 from vector<1x1x1xf32>
      %cst_27 = arith.constant 0.000000e+00 : f32
      %44 = vector.broadcast %43 : f32 to vector<1x128xf32>
      %45 = vector.broadcast %cst_27 : f32 to vector<1x128xf32>
      %46 = arith.select %38, %44, %45 : vector<1x128xi1>, vector<1x128xf32>
      %c1_i32_28 = arith.constant 1 : i32
      %47 = vector.broadcast %c1_i32_28 : i32 to vector<1x128xi32>
      %48 = arith.cmpi eq, %36, %47 : vector<1x128xi32>
      %c0_29 = arith.constant 0 : index
      %c0_30 = arith.constant 0 : index
      %49 = vector.load %arg7[%c0_29, %c0_30] : memref<8x128xf32, #tpu.memory_space<vmem>>, vector<8x128xf32>
      %50 = vector.shape_cast %49 : vector<8x128xf32> to vector<1x8x128xf32>
      %cst_31 = arith.constant dense<0.000000e+00> : vector<1xf32>
      %51 = vector.multi_reduction <add>, %50, %cst_31 [1, 2] : vector<1x8x128xf32> to vector<1xf32>
      %52 = vector.shape_cast %51 : vector<1xf32> to vector<1x1x1xf32>
      %53 = vector.extract %52[0, 0, 0] : f32 from vector<1x1x1xf32>
      %cst_32 = arith.constant 0.000000e+00 : f32
      %54 = vector.broadcast %53 : f32 to vector<1x128xf32>
      %55 = vector.broadcast %cst_32 : f32 to vector<1x128xf32>
      %56 = arith.select %48, %54, %55 : vector<1x128xi1>, vector<1x128xf32>
      %57 = arith.addf %46, %56 : vector<1x128xf32>
      %c2_i32 = arith.constant 2 : i32
      %58 = vector.broadcast %c2_i32 : i32 to vector<1x128xi32>
      %59 = arith.cmpi eq, %36, %58 : vector<1x128xi32>
      %c0_33 = arith.constant 0 : index
      %c0_34 = arith.constant 0 : index
      %60 = vector.load %arg8[%c0_33, %c0_34] : memref<8x128xf32, #tpu.memory_space<vmem>>, vector<8x128xf32>
      %61 = vector.shape_cast %60 : vector<8x128xf32> to vector<1x8x128xf32>
      %cst_35 = arith.constant dense<0.000000e+00> : vector<1xf32>
      %62 = vector.multi_reduction <add>, %61, %cst_35 [1, 2] : vector<1x8x128xf32> to vector<1xf32>
      %63 = vector.shape_cast %62 : vector<1xf32> to vector<1x1x1xf32>
      %64 = vector.extract %63[0, 0, 0] : f32 from vector<1x1x1xf32>
      %cst_36 = arith.constant 0.000000e+00 : f32
      %65 = vector.broadcast %64 : f32 to vector<1x128xf32>
      %66 = vector.broadcast %cst_36 : f32 to vector<1x128xf32>
      %67 = arith.select %59, %65, %66 : vector<1x128xi1>, vector<1x128xf32>
      %68 = arith.addf %57, %67 : vector<1x128xf32>
      %c0_37 = arith.constant 0 : index
      %c0_38 = arith.constant 0 : index
      %69 = vector.load %arg5[%c0_37, %c0_38] : memref<1x128xf32, #tpu.memory_space<vmem>>, vector<1x128xf32>
      tpu.vector_store %arg5[%c0_37, %c0_38], %68 {strides = array<i32>} : memref<1x128xf32, #tpu.memory_space<vmem>>, vector<1x128xf32>,
    } else {
    }
    return
  }
  func.func @transform_0(%arg0: i32) -> (i32, i32) {
    %c0_i32 = arith.constant 0 : i32
    %c0_i32_0 = arith.constant 0 : i32
    return %arg0, %c0_i32 : i32, i32
  }
  func.func @transform_1(%arg0: i32) -> (i32, i32) {
    %c0_i32 = arith.constant 0 : i32
    %c0_i32_0 = arith.constant 0 : i32
    return %arg0, %c0_i32 : i32, i32
  }
  func.func @transform_2(%arg0: i32) -> (i32, i32) {
    %c0_i32 = arith.constant 0 : i32
    %c0_i32_0 = arith.constant 0 : i32
    return %arg0, %c0_i32 : i32, i32
  }
  func.func @transform_3(%arg0: i32) -> (i32, i32) {
    %c0_i32 = arith.constant 0 : i32
    %c0_i32_0 = arith.constant 0 : i32
    return %arg0, %c0_i32 : i32, i32
  }
  func.func @transform_4(%arg0: i32) -> (i32, i32) {
    %c0_i32 = arith.constant 0 : i32
    %c0_i32_0 = arith.constant 0 : i32
    %c0_i32_1 = arith.constant 0 : i32
    return %c0_i32, %c0_i32_0 : i32, i32
  }
}

</mosaic_0001>

<bundles_post_ra>
// kernel: tpu_custom_call.1
= control target key start
LH: loop header
LB: loop body
LE: loop exit
PB: predicated region body
PF: predicated region fallthrough
CT: control target
= control target key end

     0   :  { %9 = vsyncpa [#allocation6], 0  ;;  %s1076_s0 = inlined_call_operand.hbm [shape: f32[9,128], index: 0, kind: input, shape index: {}]   ;;  %s1077_s1 = inlined_call_operand.hbm [shape: f32[9,128], index: 1, kind: input, shape index: {}]   ;;  %s1078_s2 = inlined_call_operand.hbm [shape: f32[9,128], index: 2, kind: input, shape index: {}]   ;;  %s1079_s3 = inlined_call_operand.hbm [shape: f32[9,128], index: 3, kind: input, shape index: {}]   ;;  %s1080_s4 = inlined_call_operand.hbm [shape: f32[1,128], index: 4, kind: output, shape index: {}]  }
   0x1   :  { %11 = vsyncpa [#allocation6 + $0x1], 0 }
   0x2   :  { %12 = vsyncpa [#allocation9], 0 }
   0x3   :  { %14 = vsyncpa [#allocation9 + $0x1], 0 }
   0x4   :  { %15 = vsyncpa [#allocation12], 0 }
   0x5   :  { %17 = vsyncpa [#allocation12 + $0x1], 0 }
   0x6   :  { %18 = vsyncpa [#allocation7], 0  ;;  %s831_s15 = smov 0   ;;  %s833_s16 = smov 0  }
   0x7   :  { %s835_s17 = smov 0   ;;  %s837_s18 = smov 0  }
   0x8 LB: > { %s850_s19 = sadd.s32 4294967295, %s798_s18   ;;  %s853_s20 = sadd.s32 1, %s798_s18   ;;  %s798_s18 = sphi %s837_s18, %s1097_s18   ;;  %s794_s17 = sphi %s835_s17, %s1096_s17   ;;  %s790_s16 = sphi %s833_s16, %s1095_s16   ;;  %s786_s15 = sphi %s831_s15, %s1094_s15  }
   0x9   : > { %s28_s21 = ssub.s32 %s798_s18, %s853_s20  ;;  %s31_s22 = sadd.s32 1, %s794_s17 }
   0xa   : > { %p29_p0 = scmp.eq.s32.totalorder %s28_s21, 0  ;;  %p38_p1 = scmp.ne.s32.totalorder %s794_s17, %s790_s16 }
   0xb   : > { %p39_p2 = scmp.eq.s32.totalorder %s798_s18, 0  ;;  %p44_p3 = scmp.ne.s32.totalorder %s790_s16, %s786_s15 }
   0xc   : > { %s863_s23 = scalar_select %p29_p0, %s794_s17, %s31_s22  }
   0xd   : > { %p40_p4 = por %p39_p2, %p38_p1  ;;  %p45_p5 = scmp.eq.s32.totalorder %s850_s19, 0 }
   0xe   : > { %p569_p6 = scmp.lt.s32.totalorder %s798_s18, 2  ;;  %s872_s25 = sand.u32 1, %s794_s17  }
   0xf   : > { %p867_p7 = por %p45_p5, %p44_p3  ;;  %s875_s26 = sshll.u32 %s872_s25, 3 }
  0x10   : > { %s878_s27 = sshll.u32 %s798_s18, 7  ;;  %p880_p8 = pnand %p569_p6, %p40_p4 }
  0x11   : > { %s1084_s24 = scalar_select %p867_p7, 1, 0 }
  0x12   : > { %s1085_s28 = scalar_select %p880_p8, 1, 0 }
  0x13   : > { %s185_s29 = sand.u32 1, %s798_s18   ;;  %s889_s6 = scalar_lea.hbm %s1077_s1, %s878_s27 }
  0x14   : > { %s189_s7 = scalar_lea.vmem [#allocation8], %s875_s26  ;;  %s896_s9 = scalar_lea.sflag [#allocation9], %s185_s29 }
  0x15   : > { %s196_s8 = sshll.u32 %s189_s7, 4  ;;  %s606_s10 = scalar_lea.hbm %s889_s6, 128  ;;  %s893_s8 = int_to_ptr.vmem [resolvable:$true] %s196_s8 }
  0x16   : > { %p607_p11 = scmp.ne.s32.totalorder %s889_s6, %s606_s10  ;;  %p902_p12 = pneg %p880_p8 }
  0x17   : > { %s611_s14 = scalar_lea.hbm %s1077_s1, 256  ;;  %p612_p1 = scmp.lt.u32.totalorder %s889_s6, %s1077_s1 }
  0x18   : > { %p609_p13 = pnand %p902_p12, %p607_p11  ;;  %p613_p2 = scmp.lt.u32.totalorder %s611_s14, %s606_s10 }
  0x19   : > { %p615_p4 = scmp.lt.u32.totalorder %s606_s10, %s889_s6 }
  0x1a   : > { %p610_p0 = pneg %p609_p13  ;;  %p614_p3 = por %p613_p2, %p612_p1 }
  0x1c   : > { %p616_p5 = por %p615_p4, %p614_p3 }
  0x1e   : > { %p617_p6 = pnand %p616_p5, %p610_p0 }
  0x20   : > { %620 = shalt.err (!%p617_p6)
}
  0x21   : > { %s621_s22 = scalar_lea.vmem %s893_s8, 128  ;;  %s800_s29 = smov [#allocation8]  }
  0x22   : > { %p622_p11 = scmp.ne.s32.totalorder %s893_s8, %s621_s22  ;;  %s626_s30 = sshll.u32 %s800_s29, 4  ;;  %s627_s30 = int_to_ptr.vmem [resolvable:$false] %s626_s30 }
  0x23   : > { %s628_s5 = scalar_lea.vmem %s627_s30, 256  ;;  %p629_p10 = scmp.lt.s32.totalorder %s893_s8, %s627_s30 }
  0x24   : > { %p624_p13 = pnand %p622_p11, %p902_p12  ;;  %p630_p7 = scmp.lt.s32.totalorder %s628_s5, %s621_s22 }
  0x26   : > { %p625_p9 = pneg %p624_p13  ;;  %p631_p1 = por %p630_p7, %p629_p10 }
  0x28   : > { %p632_p2 = pnand %p631_p1, %p625_p9 }
  0x2a   : > { %635 = shalt.err (!%p632_p2)
}
  0x2b   : > { %562 = dma.hbm_to_vmem [thread:$0]  (!%p880_p8), %s889_s6, 128, %s893_s8, %s896_s9  }
  0x2c   : > { %p1087_p0 = scmp.lt.s32.totalorder %s798_s18, 3  ;;  %p1088_p3 = scmp.ge.s32.totalorder %s798_s18, 1 }
  0x2d   : > { %s938_s13 = scalar_lea.hbm %s1076_s0, %s878_s27  ;;  %s171_s14 = scalar_lea.vmem [#allocation5], %s875_s26 }
  0x2e   : > { %p930_p4 = pnand %p1088_p3, %p1087_p0  ;;  %s178_s15 = sshll.u32 %s171_s14, 4  ;;  %s941_s15 = int_to_ptr.vmem [resolvable:$true] %s178_s15 }
  0x2f   : > { %s947_s18 = scalar_lea.hbm %s1078_s2, %s878_s27  ;;  %s168_s21 = scalar_lea.sflag [#allocation6], %s872_s25 }
  0x30   : > { %s1089_s7 = scalar_select %p930_p4, 1, 0 }
  0x31   : > { %s636_s22 = scalar_lea.hbm %s938_s13, 128  ;;  %s641_s5 = scalar_lea.hbm %s1076_s0, 256 }
  0x32   : > { %p637_p7 = scmp.ne.s32.totalorder %s938_s13, %s636_s22  ;;  %p642_p5 = scmp.lt.u32.totalorder %s938_s13, %s1076_s0 }
  0x33   : > { %p643_p6 = scmp.lt.u32.totalorder %s641_s5, %s636_s22  ;;  %p645_p13 = scmp.lt.u32.totalorder %s636_s22, %s938_s13 }
  0x34   : > { %p639_p9 = pnand %p637_p7, %p902_p12 }
  0x35   : > { %p644_p11 = por %p643_p6, %p642_p5 }
  0x36   : > { %p640_p10 = pneg %p639_p9 }
  0x37   : > { %p646_p1 = por %p645_p13, %p644_p11 }
  0x39   : > { %p647_p2 = pnand %p646_p1, %p640_p10 }
  0x3b   : > { %650 = shalt.err (!%p647_p2)
}
  0x3c   : > { %s651_s14 = scalar_lea.vmem %s941_s15, 128  ;;  %s801_s6 = smov [#allocation5]  }
  0x3d   : > { %p652_p0 = scmp.ne.s32.totalorder %s941_s15, %s651_s14  ;;  %s656_s8 = sshll.u32 %s801_s6, 4  ;;  %s657_s8 = int_to_ptr.vmem [resolvable:$false] %s656_s8 }
  0x3e   : > { %s658_s29 = scalar_lea.vmem %s657_s8, 256  ;;  %p659_p9 = scmp.lt.s32.totalorder %s941_s15, %s657_s8 }
  0x3f   : > { %p654_p3 = pnand %p652_p0, %p902_p12  ;;  %p660_p4 = scmp.lt.s32.totalorder %s658_s29, %s651_s14 }
  0x41   : > { %p655_p7 = pneg %p654_p3  ;;  %p661_p5 = por %p660_p4, %p659_p9 }
  0x43   : > { %p662_p6 = pnand %p661_p5, %p655_p7 }
  0x45   : > { %665 = shalt.err (!%p662_p6)
}
  0x46   : > { %559 = dma.hbm_to_vmem [thread:$0]  (!%p880_p8), %s938_s13, 128, %s941_s15, %s168_s21  }
  0x47   : > { %s207_s22 = scalar_lea.vmem [#allocation10], %s875_s26  ;;  %s666_s5 = scalar_lea.hbm %s947_s18, 128 }
  0x48   : > { %s214_s30 = sshll.u32 %s207_s22, 4  ;;  %p667_p10 = scmp.ne.s32.totalorder %s947_s18, %s666_s5  ;;  %s215_s30 = int_to_ptr.vmem [resolvable:$true] %s214_s30 }
  0x49   : > { %s671_s14 = scalar_lea.hbm %s1078_s2, 256  ;;  %p672_p13 = scmp.lt.u32.totalorder %s947_s18, %s1078_s2 }
  0x4a   : > { %p669_p4 = pnand %p667_p10, %p902_p12  ;;  %p673_p1 = scmp.lt.u32.totalorder %s671_s14, %s666_s5 }
  0x4b   : > { %p675_p0 = scmp.lt.u32.totalorder %s666_s5, %s947_s18 }
  0x4c   : > { %p670_p11 = pneg %p669_p4  ;;  %p674_p2 = por %p673_p1, %p672_p13 }
  0x4e   : > { %p676_p3 = por %p675_p0, %p674_p2 }
  0x50   : > { %p677_p7 = pnand %p676_p3, %p670_p11 }
  0x52   : > { %680 = shalt.err (!%p677_p7)
}
  0x53   : > { %s681_s13 = scalar_lea.vmem %s215_s30, 128  ;;  %s802_s15 = smov [#allocation10]  }
  0x54   : > { %p682_p9 = scmp.ne.s32.totalorder %s215_s30, %s681_s13  ;;  %s686_s21 = sshll.u32 %s802_s15, 4  ;;  %s687_s21 = int_to_ptr.vmem [resolvable:$false] %s686_s21 }
  0x55   : > { %s688_s29 = scalar_lea.vmem %s687_s21, 256  ;;  %p689_p10 = scmp.lt.s32.totalorder %s215_s30, %s687_s21 }
  0x56   : > { %p684_p5 = pnand %p682_p9, %p902_p12  ;;  %p690_p4 = scmp.lt.s32.totalorder %s688_s29, %s681_s13 }
  0x58   : > { %p685_p6 = pneg %p684_p5  ;;  %p691_p8 = por %p690_p4, %p689_p10 }
  0x5a   : > { %p692_p1 = pnand %p691_p8, %p685_p6 }
  0x5c   : > { %695 = shalt.err (!%p692_p1)
}
  0x5d   : > { %p1090_p13 = scmp.ne.s32.totalorder %s1085_s28, 0  ;;  %s994_s10 = scalar_lea.hbm %s1079_s3, %s878_s27 }
  0x5e   : > { %s225_s12 = scalar_lea.vmem [#allocation11], %s875_s26  ;;  %s222_s6 = scalar_lea.sflag [#allocation12], %s872_s25 }
  0x5f   : > { %565 = dma.hbm_to_vmem [thread:$0]  (!%p1090_p13), %s947_s18, 128, %s215_s30, %s896_s9  }
  0x60   : > { %s232_s14 = sshll.u32 %s225_s12, 4  ;;  %s696_s8 = scalar_lea.hbm %s994_s10, 128  ;;  %s233_s14 = int_to_ptr.vmem [resolvable:$true] %s232_s14 }
  0x61   : > { %p697_p8 = scmp.ne.s32.totalorder %s994_s10, %s696_s8  ;;  %s701_s18 = scalar_lea.hbm %s1079_s3, 256 }
  0x62   : > { %p702_p0 = scmp.lt.u32.totalorder %s994_s10, %s1079_s3  ;;  %p703_p3 = scmp.lt.u32.totalorder %s701_s18, %s696_s8 }
  0x63   : > { %p699_p11 = pnand %p697_p8, %p902_p12  ;;  %p705_p9 = scmp.lt.u32.totalorder %s696_s8, %s994_s10 }
  0x64   : > { %p704_p7 = por %p703_p3, %p702_p0 }
  0x65   : > { %p700_p2 = pneg %p699_p11 }
  0x66   : > { %p706_p5 = por %p705_p9, %p704_p7 }
  0x68   : > { %p707_p6 = pnand %p706_p5, %p700_p2 }
  0x6a   : > { %710 = shalt.err (!%p707_p6)
}
  0x6b   : > { %s711_s25 = scalar_lea.vmem %s233_s14, 128  ;;  %s803_s26 = smov [#allocation11]  }
  0x6c   : > { %p712_p10 = scmp.ne.s32.totalorder %s233_s14, %s711_s25  ;;  %s716_s15 = sshll.u32 %s803_s26, 4  ;;  %s717_s15 = int_to_ptr.vmem [resolvable:$false] %s716_s15 }
  0x6d   : > { %s718_s21 = scalar_lea.vmem %s717_s15, 256  ;;  %p719_p8 = scmp.lt.s32.totalorder %s233_s14, %s717_s15 }
  0x6e   : > { %p714_p4 = pnand %p712_p10, %p902_p12  ;;  %p720_p11 = scmp.lt.s32.totalorder %s718_s21, %s711_s25 }
  0x70   : > { %p715_p1 = pneg %p714_p4  ;;  %p721_p13 = por %p720_p11, %p719_p8 }
  0x72   : > { %p722_p0 = pnand %p721_p13, %p715_p1 }
  0x74   : > { %725 = shalt.err (!%p722_p0)
}
  0x75   : > { %p1091_p3 = scmp.ne.s32.totalorder %s1085_s28, 0  ;;  %p1092_p2 = scmp.ne.s32.totalorder %s1089_s7, 0 }
  0x76   : > { %s243_s11 = sand.u32 (!%p1092_p2), 1, %s790_s16   ;;  %p1093_p12 = scmp.ne.s32.totalorder (!%p1092_p2), %s1084_s24, 0 }
  0x77   : > { %568 = dma.hbm_to_vmem [thread:$0]  (!%p1091_p3), %s994_s10, 128, %s233_s14, %s222_s6  }
  0x78   : > { %241 = sbr.rel (%p1092_p2) target bundleno = 402 (0x192), region = 36  ;;  %s1018_s29 = sshll.u32 (!%p1092_p2), %s243_s11, 3 }
  0x79   : > { %s244_s22 = scalar_lea.sflag (!%p1092_p2), [#allocation6], %s243_s11  ;;  %s247_s5 = scalar_lea.vmem (!%p1092_p2), [#allocation5], %s1018_s29 }
  0x7f   : > { %769 = dma.done.wait (%p1093_p12), %s244_s22, 128  }
  0x80   : > { %771 = vsyncadd (%p1093_p12), %s244_s22, 4294967168  ;;  %s252_s28 = sand.u32 1, %s850_s19   ;;  %s256_s7 = scalar_lea.vmem [#allocation8], %s1018_s29 }
  0x81   : > { %s253_s10 = scalar_lea.sflag [#allocation9], %s252_s28 }
  0x82   : > { %773 = dma.done.wait (%p1093_p12), %s253_s10, 256  }
  0x83   : > { %775 = vsyncadd (%p1093_p12), %s253_s10, 4294967040  ;;  %s265_s12 = scalar_lea.vmem [#allocation10], %s1018_s29  ;;  %s271_s14 = scalar_lea.sflag [#allocation12], %s243_s11 }
  0x84   : > { %s274_s6 = scalar_lea.vmem [#allocation11], %s1018_s29 }
  0x85   : > { %777 = dma.done.wait (%p1093_p12), %s271_s14, 128  }
  0x86   : > { %779 = vsyncadd (%p1093_p12), %s271_s14, 4294967168  ;;  %p531_p13 = scmp.ne.s32.totalorder %s850_s19, 0 }
  0x87   : > { %v804_v0 = vmov (!%p531_p13), 0.0  }
  0x88   : > { %312 = sbr.rel (%p531_p13) target bundleno = 143 (0x8f), region = 56  ;;  %313 = vst [vmem:[#allocation2] sm:$0xff] (!%p531_p13), %v804_v0  ;;  %314 = vst [vmem:[#allocation3] sm:$0xff] (!%p531_p13), %v804_v0 }
  0x89   : > { %315 = vst [vmem:[#allocation4] sm:$0xff] (!%p531_p13), %v804_v0 }
  0x8f PF: > { %v316_v1 = vlaneseq  ;;  %s532_s8 = sshll.u32 %s850_s19, 3  ;;  %v324_v2 = vld [vmem:[%s265_s12] sm:$0xff]  ;;  %v327_v5 = vld [vmem:[%s256_s7] sm:$0xff]  ;;  %p533_p7 = scmp.ne.s32.totalorder %s850_s19, 1 }
  0x90   : > { %v325_v3 = vld [vmem:[%s247_s5] sm:$0xff]  ;;  %s319_s13 = ssub.s32 9, %s532_s8  ;;  %v322_v8 = vld [vmem:[%s274_s6] sm:$0xff]  ;;  %v328_v9 = vsub.f32 %v327_v5, %v324_v2 }
  0x91   : > { %v326_v4 = vsub.f32 %v325_v3, %v324_v2  ;;  %v317_v6 = vshrl.u32 %v316_v1, 7  ;;  %v320_v7 = vstv %s319_s13  ;;  %v341_v11 = vld [vmem:[#allocation4] sm:$0xff]  ;;  %v329_v14 = vld [vmem:[#allocation2] sm:$0xff]  ;;  %v335_v17 = vld [vmem:[#allocation3] sm:$0xff]  ;;  %v349_v47 = vand.u32 (!%p533_p7), 127, %v316_v1 }
  0x92   : > { %v336_v12 = vmul.f32 %v328_v9, %v328_v9 }
  0x93   : > { %v330_v10 = vmul.f32 %v326_v4, %v326_v4  ;;  %vm321_vm0 = vcmp.lt.s32.totalorder %v317_v6, %v320_v7  ;;  %vm350_vm1 = vcmp.eq.s32.totalorder (!%p533_p7), %v349_v47, 0  ;;  %vm363_vm2 = vcmp.eq.s32.totalorder (!%p533_p7), %v349_v47, 1 }
  0x94   : > { %v323_v13 = vsel %vm321_vm0, %v322_v8, 0.0  ;;  %v337_v18 = vsel %vm321_vm0, %v336_v12, 0.0  ;;  %347 = sbr.rel (%p533_p7) target bundleno = 377 (0x179), region = 60  ;;  %vm377_vm3 = vcmp.eq.s32.totalorder (!%p533_p7), %v349_v47, 2 }
  0x95   : > { %v331_v15 = vsel %vm321_vm0, %v330_v10, 0.0  ;;  %v342_v19 = vadd.f32 %v341_v11, %v323_v13  ;;  %v338_v20 = vmul.f32 %v337_v18, %v323_v13 }
  0x96   : > { %v332_v16 = vmul.f32 %v331_v15, %v323_v13 }
  0x97   : > { %343 = vst [vmem:[#allocation4] sm:$0xff] %v342_v19  ;;  %v339_v22 = vadd.f32 %v338_v20, %v335_v17 }
  0x98   : > { %v333_v21 = vadd.f32 %v332_v16, %v329_v14 }
  0x99   : > { %340 = vst [vmem:[#allocation3] sm:$0xff] %v339_v22 }
  0x9a   : > { %334 = vst [vmem:[#allocation2] sm:$0xff] %v333_v21 }
  0x9e   : > { %v378_v23 = vld [vmem:[#allocation4] sm:$0xff] }
  0x9f   : > { %379 = vadd.xlane.f32.xlu1 %v378_v23 }
  0xa0   : > { %v364_v25 = vld [vmem:[#allocation3] sm:$0xff] }
  0xa1   : > { %v351_v24 = vld [vmem:[#allocation2] sm:$0xff] }
  0xa2   : > { %352 = vadd.xlane.f32.xlu0 %v351_v24 }
  0xa6   : > { %365 = vadd.xlane.f32.xlu0 %v364_v25 }
 0x12c   : > { %v380_v26 = vpop.xlane.xlu1 %379 }
 0x12d   : > { %v381_v28 = vrot.slane %v380_v26, 4 }
 0x12f   : > { %v353_v27 = vpop.xlane.xlu0 %352  ;;  %v382_v30 = vadd.f32 %v381_v28, %v380_v26 }
 0x130   : > { %v354_v29 = vrot.slane %v353_v27, 4 }
 0x131   : > { %v383_v33 = vrot.slane %v382_v30, 2 }
 0x132   : > { %v355_v31 = vadd.f32 %v354_v29, %v353_v27 }
 0x133   : > { %v366_v32 = vpop.xlane.xlu0 %365  ;;  %v384_v38 = vadd.f32 %v383_v33, %v382_v30 }
 0x134   : > { %v356_v34 = vrot.slane %v355_v31, 2  ;;  %v367_v35 = vrot.slane %v366_v32, 4 }
 0x135   : > { %v385_v43 = vrot.slane %v384_v38, 1 }
 0x136   : > { %v368_v36 = vadd.f32 %v367_v35, %v366_v32  ;;  %v357_v37 = vadd.f32 %v356_v34, %v355_v31 }
 0x137   : > { %v386_v46 = vadd.f32 %v385_v43, %v384_v38 }
 0x138   : > { %v369_v39 = vrot.slane %v368_v36, 2  ;;  %v358_v40 = vrot.slane %v357_v37, 1 }
 0x13a   : > { %v370_v41 = vadd.f32 %v369_v39, %v368_v36  ;;  %v359_v42 = vadd.f32 %v358_v40, %v357_v37 }
 0x13c   : > { %538 = vpush %v359_v42  ;;  %v371_v44 = vrot.slane %v370_v41, 1 }
 0x13e   : > { %v372_v45 = vadd.f32 %v371_v44, %v370_v41 }
 0x140   : > { %540 = vpush %v372_v45 }
 0x141   : > { %542 = vpush %v386_v46 }
 0x16d   : > { %s539_s24 = spop %538 }
 0x16e   : > { %v361_v48 = vstv %s539_s24 }
 0x16f   : > { %v362_v50 = vsel %vm350_vm1, %v361_v48, 0.0 }
 0x171   : > { %s541_s9 = spop %540 }
 0x172   : > { %v374_v49 = vstv %s541_s9  ;;  %s543_s18 = spop %542 }
 0x173   : > { %v375_v51 = vsel %vm363_vm2, %v374_v49, 0.0  ;;  %v388_v52 = vstv %s543_s18 }
 0x174   : > { %v376_v53 = vadd.f32 %v375_v51, %v362_v50  ;;  %v389_v54 = vsel %vm377_vm3, %v388_v52, 0.0 }
 0x176   : > { %v390_v55 = vadd.f32 %v389_v54, %v376_v53 }
 0x178   : > { %391 = vst [vmem:[#allocation13] sm:$0x1] %v390_v55 }
 0x179 PF: > { %p570_p9 = scmp.eq.s32.totalorder %s850_s19, 1  ;;  %s805_s30 = smov [#allocation13]  }
 0x17a   : > { %s399_s27 = sshll.u32 %s805_s30, 4  ;;  %s400_s27 = int_to_ptr.vmem [resolvable:$true] %s399_s27 }
 0x17b   : > { %s726_s25 = scalar_lea.vmem %s400_s27, 16  ;;  %s732_s26 = scalar_lea.vmem %s400_s27, 32 }
 0x17c   : > { %p727_p5 = scmp.ne.s32.totalorder %s400_s27, %s726_s25  ;;  %p733_p4 = scmp.lt.s32.totalorder %s400_s27, %s400_s27 }
 0x17d   : > { %p734_p1 = scmp.lt.s32.totalorder %s732_s26, %s726_s25 }
 0x17e   : > { %p728_p6 = pnand %p727_p5, %p570_p9 }
 0x17f   : > { %p735_p8 = por %p734_p1, %p733_p4 }
 0x180   : > { %p729_p10 = pneg %p728_p6 }
 0x182   : > { %p736_p11 = pnand %p735_p8, %p729_p10 }
 0x184   : > { %739 = shalt.err (!%p736_p11)
}
 0x185   : > { %s740_s11 = scalar_lea.hbm %s1080_s4, 16 }
 0x186   : > { %p741_p0 = scmp.ne.s32.totalorder %s1080_s4, %s740_s11  ;;  %p746_p12 = scmp.lt.u32.totalorder %s740_s11, %s1080_s4 }
 0x188   : > { %p742_p3 = pnand %p741_p0, %p570_p9 }
 0x18a   : > { %p743_p2 = pneg %p742_p3 }
 0x18c   : > { %p748_p13 = pnand %p746_p12, %p743_p2 }
 0x18e   : > { %751 = shalt.err (!%p748_p13)
}
 0x18f   : > { %553 = dma.vmem_to_hbm [thread:$0]  (%p570_p9), %s400_s27, 16, %s1080_s4, [#allocation7]  }
 0x190   : > { %781 = dma.done.wait (%p570_p9), [#allocation7], 16  }
 0x191   : > { %783 = vsyncadd (%p570_p9), [#allocation7], 4294967280 }
 0x192 PF: > { %p21_p7 = scmp.ge.s32.totalorder %s853_s20, 4   ;;  %s1094_s15 = smov %s790_s16 }
 0x193   : > { %s1095_s16 = smov %s794_s17  ;;  %s1096_s17 = smov %s863_s23 }
 0x194   : > { %s1097_s18 = smov %s853_s20  ;;  %23 = sbr.rel (!%p21_p7) target bundleno = 8 (0x8), region = 118 }
 0x19b   :  { %412 = vsyncpa [#allocation6], 1 }
 0x19c   :  { %414 = vsyncpa [#allocation6 + $0x1], 1 }
 0x19d   :  { %415 = vsyncpa [#allocation9], 1 }
 0x19e   :  { %417 = vsyncpa [#allocation9 + $0x1], 1 }
 0x19f   :  { %418 = vsyncpa [#allocation12], 1 }
 0x1a0   :  { %420 = vsyncpa [#allocation12 + $0x1], 1 }
 0x1a1   :  { %421 = vsyncpa [#allocation7], 1 }
 0x1a2   :  { %423 = vsyncpa [#allocation7 + $0x1], 1 }

</bundles_post_ra>
